<compile_context>
chip_gen: v7x
topology: tpu7x:2x2x1
jax: 0.10.0
libtpu: 0.0.40
codegen_flags: <defaults>
</compile_context>

<pallas_src>
import functools

import jax
import jax.numpy as jnp
from jax.experimental import pallas as pl
from jax.experimental.pallas import tpu as pltpu  # noqa: F401  (kept for TPU-specific tuning hooks)

LANES = 128  # one vreg lane block; each GLU half occupies one 128-lane block


# ---------------------------------------------------------------------------
# Single fused kernel, single invocation (no grid): whole batch end to end.
#   x_ref            : (n*l, 128)   channels-last input, batch folded into M
#   w{1,2,3}_ref     : (k*c_in, 256) conv weights; out half lanes [0,128), gate [128,256)
#   b{1,2,3}_ref     : (1, 256)
#   wl_ref / bl_ref  : (3f, 256) / (1, 256)  fused layer1 (mean) + layer2 (logvar)
#   eps_ref          : (n, 128)     reparametrization noise, live lanes [0, 3f)
#   o_ref            : (8, 128)     rows [0,n)=sample, [n,2n)=mean, [2n,3n)=logvar
# ---------------------------------------------------------------------------
def fused_cnn_kernel(x_ref, w1_ref, b1_ref, w2_ref, b2_ref, w3_ref, b3_ref,
                     wl_ref, bl_ref, eps_ref, o_ref, *, k, n, l, f):
    p = k // 2

    def conv_glu(a, w_ref, b_ref):
        # a: (n*l, c_in) live-lane activations.  'same' padding + per-batch
        # separation are done with in-register zero rows; the k taps are folded
        # into one MXU contraction (im2col), and out+gate come from ONE matmul.
        cin = a.shape[1]
        z = jnp.zeros((p, cin), jnp.float32)
        per_batch = []
        for bi in range(n):
            apn = jnp.concatenate([z, a[bi * l:(bi + 1) * l, :], z], axis=0)      # (l+2p, cin)
            per_batch.append(
                jnp.concatenate([apn[t:t + l, :] for t in range(k)], axis=1))     # (l, k*cin)
        cols = jnp.concatenate(per_batch, axis=0)                                  # (n*l, k*cin)
        r = jnp.dot(cols, w_ref[...], preferred_element_type=jnp.float32) + b_ref[...]
        # GLU: split at the 128-lane vreg boundary (lane-aligned, no shuffles).
        return r[:, :LANES] * jax.nn.sigmoid(r[:, LANES:])                         # (n*l, 128)

    a = conv_glu(x_ref[...], w1_ref, b1_ref)          # conv1 + GLU, live lanes [0, f)
    # TODO(synk): nn.Dropout(0.2) before conv2 treated as identity (eval mode).
    a = conv_glu(a[:, :f], w2_ref, b2_ref)            # conv2 + GLU, live lanes [0, 2f)
    a = conv_glu(a[:, :2 * f], w3_ref, b3_ref)        # conv3 + GLU, live lanes [0, 3f)

    # AdaptiveAvgPool1d(1) + squeeze: per-batch sublane sum * constant 1/L.
    pooled = jnp.concatenate(
        [jnp.sum(a[bi * l:(bi + 1) * l, :], axis=0, keepdims=True) for bi in range(n)],
        axis=0) * (1.0 / l)                            # (n, 128), live lanes [0, 3f)

    # layer1 + layer2 fused: mean in lanes [0,128), logvar in [128,256).
    r = jnp.dot(pooled[:, :3 * f], wl_ref[...], preferred_element_type=jnp.float32) + bl_ref[...]
    mean = jnp.maximum(r[:, :LANES], 0.0)
    logvar = jnp.maximum(r[:, LANES:], 0.0)
    sample = eps_ref[...] * jnp.exp(0.5 * logvar) + mean   # reparametrize

    pieces = [sample, mean, logvar]
    pad_rows = o_ref.shape[0] - 3 * n
    if pad_rows:
        pieces.append(jnp.zeros((pad_rows, LANES), jnp.float32))
    o_ref[...] = jnp.concatenate(pieces, axis=0)           # one full-tile store


# ---------------------------------------------------------------------------
# One-time weight packing (call OUTSIDE the per-step forward).  GLU halves are
# fused side by side into (rows, 256); only the REAL contraction rows are kept.
# ---------------------------------------------------------------------------
def pack_params(params, num_filters):
    f = num_filters

    def fuse_conv(w, b):
        kk, cin, cout = w.shape
        half = cout // 2
        W = jnp.zeros((kk * cin, 2 * LANES), jnp.float32)
        W = W.at[:, :half].set(w[:, :, :half].reshape(kk * cin, half))
        W = W.at[:, LANES:LANES + half].set(w[:, :, half:].reshape(kk * cin, half))
        B = jnp.zeros((1, 2 * LANES), jnp.float32)
        B = B.at[:, :half].set(b[:, :half])
        B = B.at[:, LANES:LANES + half].set(b[:, half:])
        return W, B

    W1, B1 = fuse_conv(params["w_c1"], params["b_c1"])
    W2, B2 = fuse_conv(params["w_c2"], params["b_c2"])
    W3, B3 = fuse_conv(params["w_c3"], params["b_c3"])

    f3 = 3 * f
    Wl = jnp.zeros((f3, 2 * LANES), jnp.float32)
    Wl = Wl.at[:, :f3].set(params["w_l1"])
    Wl = Wl.at[:, LANES:LANES + f3].set(params["w_l2"])
    Bl = jnp.zeros((1, 2 * LANES), jnp.float32)
    Bl = Bl.at[:, :f3].set(params["b_l1"])
    Bl = Bl.at[:, LANES:LANES + f3].set(params["b_l2"])

    return dict(W1=W1, B1=B1, W2=W2, B2=B2, W3=W3, B3=B3, Wl=Wl, Bl=Bl)


# ---------------------------------------------------------------------------
# Forward: single pallas_call, no grid (whole arrays in VMEM; ~0.5 MB total).
# ---------------------------------------------------------------------------
@jax.jit
def cnn_forward(x_nlc, packed, eps):
    n, l, cin = x_nlc.shape
    f3 = eps.shape[1]
    f = f3 // 3
    k = packed["W1"].shape[0] // cin
    out_rows = max(8, ((3 * n + 7) // 8) * 8)

    x2d = x_nlc.reshape(n * l, cin)
    epsp = jnp.zeros((n, LANES), jnp.float32).at[:, :f3].set(eps)

    kern = functools.partial(fused_cnn_kernel, k=k, n=n, l=l, f=f)
    res = pl.pallas_call(
        kern,
        out_shape=jax.ShapeDtypeStruct((out_rows, LANES), jnp.float32),
    )(x2d, packed["W1"], packed["B1"], packed["W2"], packed["B2"],
      packed["W3"], packed["B3"], packed["Wl"], packed["Bl"], epsp)

    out = res[0:n, :f3]           # sample
    out1 = res[n:2 * n, :f3]      # mean
    out2 = res[2 * n:3 * n, :f3]  # logvar
    return out, out1, out2


# ---------------------------------------------------------------------------
# Pure-JAX reference for correctness checking (unpadded, natural shapes).
# ---------------------------------------------------------------------------
def ref_forward(x_nlc, params, eps, k):
    def conv_glu_ref(x, w, b):
        pad = k // 2
        L = x.shape[1]
        xp = jnp.pad(x, ((0, 0), (pad, pad), (0, 0)))
        acc = sum(
            jnp.einsum("nlc,cd->nld", xp[:, t:t + L, :], w[t]) for t in range(k)
        ) + b[0]
        ch = acc.shape[2] // 2
        return acc[..., :ch] * jax.nn.sigmoid(acc[..., ch:])

    x = conv_glu_ref(x_nlc, params["w_c1"], params["b_c1"])
    x = conv_glu_ref(x, params["w_c2"], params["b_c2"])
    x = conv_glu_ref(x, params["w_c3"], params["b_c3"])
    pooled = jnp.mean(x, axis=1)
    h1 = jnp.maximum(pooled @ params["w_l1"] + params["b_l1"][0], 0.0)
    h2 = jnp.maximum(pooled @ params["w_l2"] + params["b_l2"][0], 0.0)
    out = eps * jnp.exp(0.5 * h2) + h1
    return out, h1, h2


def init_params(key, num_filters, k, c_in):
    f = num_filters
    shapes = {
        "w_c1": (k, c_in, 2 * f),
        "b_c1": (1, 2 * f),
        "w_c2": (k, f, 4 * f),
        "b_c2": (1, 4 * f),
        "w_c3": (k, 2 * f, 6 * f),   # inferred conv3 (see note at top)
        "b_c3": (1, 6 * f),
        "w_l1": (3 * f, 3 * f),
        "b_l1": (1, 3 * f),
        "w_l2": (3 * f, 3 * f),
        "b_l2": (1, 3 * f),
    }
    params = {}
    keys = jax.random.split(key, len(shapes))
    for (name, shp), kk in zip(shapes.items(), keys):
        fan_in = shp[-2] * (shp[0] if len(shp) == 3 else 1)
        scale = 1.0 / jnp.sqrt(jnp.float32(max(fan_in, 1)))
        params[name] = scale * jax.random.normal(kk, shp, dtype=jnp.float32)
    return params


if __name__ == "__main__":
    num_filters = 8
    k_size = 3
    N, C_IN, L = 2, 128, 16   # PyTorch input would be (N, 128, L); here (N, L, 128)

    root = jax.random.PRNGKey(0)
    k_x, k_p, k_eps = jax.random.split(root, 3)

    x = jax.random.normal(k_x, (N, L, C_IN), dtype=jnp.float32)
    params = init_params(k_p, num_filters, k_size, C_IN)
    eps = 0.1 * jax.random.normal(k_eps, (N, 3 * num_filters), dtype=jnp.float32)

    packed = pack_params(params, num_filters)          # one-time, outside the hot path

    out, out1, out2 = cnn_forward(x, packed, eps)
    out = jax.block_until_ready(out)
    out1 = jax.block_until_ready(out1)
    out2 = jax.block_until_ready(out2)

    r_out, r_out1, r_out2 = ref_forward(x, params, eps, k_size)
    assert out.shape == (N, 3 * num_filters)
    assert out1.shape == (N, 3 * num_filters)
    assert out2.shape == (N, 3 * num_filters)
    assert jnp.allclose(out, r_out, atol=1e-4), "output mismatch"
    assert jnp.allclose(out1, r_out1, atol=1e-4), "output1 mismatch"
    assert jnp.allclose(out2, r_out2, atol=1e-4), "output2 mismatch"

    print("KERNEL_OK")
</pallas_src>

<mosaic_0001>
module attributes {stable_mosaic.version = 11 : i64} {
  func.func @fused_cnn_kernel(%arg0: memref<32x128xf32, #tpu.memory_space<vmem>>, %arg1: memref<384x256xf32, #tpu.memory_space<vmem>>, %arg2: memref<1x256xf32, #tpu.memory_space<vmem>>, %arg3: memref<24x256xf32, #tpu.memory_space<vmem>>, %arg4: memref<1x256xf32, #tpu.memory_space<vmem>>, %arg5: memref<48x256xf32, #tpu.memory_space<vmem>>, %arg6: memref<1x256xf32, #tpu.memory_space<vmem>>, %arg7: memref<24x256xf32, #tpu.memory_space<vmem>>, %arg8: memref<1x256xf32, #tpu.memory_space<vmem>>, %arg9: memref<2x128xf32, #tpu.memory_space<vmem>>, %arg10: memref<8x128xf32, #tpu.memory_space<vmem>>) attributes {dimension_semantics = [], scalar_prefetch = 0 : i64, scratch_operands = 0 : i64, tpu.core_type = #tpu.core_type<tc>} {
    %c0 = arith.constant 0 : index
    %c0_0 = arith.constant 0 : index
    %0 = vector.load %arg0[%c0, %c0_0] : memref<32x128xf32, #tpu.memory_space<vmem>>, vector<32x128xf32>
    %cst = arith.constant 0.000000e+00 : f32
    %1 = vector.broadcast %cst : f32 to vector<1x128xf32>
    %2 = vector.extract_strided_slice %0 {offsets = [0, 0], sizes = [16, 128], strides = [1, 1]} : vector<32x128xf32> to vector<16x128xf32>
    %3 = tpu.concatenate %1, %2, %1 in 0 : vector<1x128xf32>, vector<16x128xf32>, vector<1x128xf32> -> vector<18x128xf32>
    %4 = vector.extract_strided_slice %3 {offsets = [0, 0], sizes = [16, 128], strides = [1, 1]} : vector<18x128xf32> to vector<16x128xf32>
    %5 = vector.extract_strided_slice %3 {offsets = [1, 0], sizes = [16, 128], strides = [1, 1]} : vector<18x128xf32> to vector<16x128xf32>
    %6 = vector.extract_strided_slice %3 {offsets = [2, 0], sizes = [16, 128], strides = [1, 1]} : vector<18x128xf32> to vector<16x128xf32>
    %7 = tpu.concatenate %4, %5, %6 in 1 : vector<16x128xf32>, vector<16x128xf32>, vector<16x128xf32> -> vector<16x384xf32>
    %8 = vector.extract_strided_slice %0 {offsets = [16, 0], sizes = [16, 128], strides = [1, 1]} : vector<32x128xf32> to vector<16x128xf32>
    %9 = tpu.concatenate %1, %8, %1 in 0 : vector<1x128xf32>, vector<16x128xf32>, vector<1x128xf32> -> vector<18x128xf32>
    %10 = vector.extract_strided_slice %9 {offsets = [0, 0], sizes = [16, 128], strides = [1, 1]} : vector<18x128xf32> to vector<16x128xf32>
    %11 = vector.extract_strided_slice %9 {offsets = [1, 0], sizes = [16, 128], strides = [1, 1]} : vector<18x128xf32> to vector<16x128xf32>
    %12 = vector.extract_strided_slice %9 {offsets = [2, 0], sizes = [16, 128], strides = [1, 1]} : vector<18x128xf32> to vector<16x128xf32>
    %13 = tpu.concatenate %10, %11, %12 in 1 : vector<16x128xf32>, vector<16x128xf32>, vector<16x128xf32> -> vector<16x384xf32>
    %14 = tpu.concatenate %7, %13 in 0 : vector<16x384xf32>, vector<16x384xf32> -> vector<32x384xf32>
    %c0_1 = arith.constant 0 : index
    %c0_2 = arith.constant 0 : index
    %15 = vector.load %arg1[%c0_1, %c0_2] : memref<384x256xf32, #tpu.memory_space<vmem>>, vector<384x256xf32>
    %cst_3 = arith.constant dense<0.000000e+00> : vector<32x256xf32>
    %16 = tpu.matmul %14, %15, %cst_3 {dimension_numbers = #tpu.dot_dimension_numbers<[1], [0], [0], [1], [0, 0, 1, 1], [], []>} : vector<32x384xf32>, vector<384x256xf32>, vector<32x256xf32> -> vector<32x256xf32>
    %c0_4 = arith.constant 0 : index
    %c0_5 = arith.constant 0 : index
    %17 = vector.load %arg2[%c0_4, %c0_5] : memref<1x256xf32, #tpu.memory_space<vmem>>, vector<1x256xf32>
    %18 = vector.broadcast %17 : vector<1x256xf32> to vector<32x256xf32>
    %19 = arith.addf %16, %18 : vector<32x256xf32>
    %20 = vector.extract_strided_slice %19 {offsets = [0, 0], sizes = [32, 128], strides = [1, 1]} : vector<32x256xf32> to vector<32x128xf32>
    %21 = vector.extract_strided_slice %19 {offsets = [0, 128], sizes = [32, 128], strides = [1, 1]} : vector<32x256xf32> to vector<32x128xf32>
    %22 = arith.negf %21 : vector<32x128xf32>
    %23 = math.exp %22 : vector<32x128xf32>
    %cst_6 = arith.constant 1.000000e+00 : f32
    %24 = vector.broadcast %cst_6 : f32 to vector<32x128xf32>
    %25 = arith.addf %24, %23 : vector<32x128xf32>
    %26 = arith.divf %24, %25 : vector<32x128xf32>
    %27 = arith.mulf %20, %26 : vector<32x128xf32>
    %28 = vector.extract_strided_slice %27 {offsets = [0, 0], sizes = [32, 8], strides = [1, 1]} : vector<32x128xf32> to vector<32x8xf32>
    %cst_7 = arith.constant 0.000000e+00 : f32
    %29 = vector.broadcast %cst_7 : f32 to vector<1x8xf32>
    %30 = vector.extract_strided_slice %28 {offsets = [0, 0], sizes = [16, 8], strides = [1, 1]} : vector<32x8xf32> to vector<16x8xf32>
    %31 = tpu.concatenate %29, %30, %29 in 0 : vector<1x8xf32>, vector<16x8xf32>, vector<1x8xf32> -> vector<18x8xf32>
    %32 = vector.extract_strided_slice %31 {offsets = [0, 0], sizes = [16, 8], strides = [1, 1]} : vector<18x8xf32> to vector<16x8xf32>
    %33 = vector.extract_strided_slice %31 {offsets = [1, 0], sizes = [16, 8], strides = [1, 1]} : vector<18x8xf32> to vector<16x8xf32>
    %34 = vector.extract_strided_slice %31 {offsets = [2, 0], sizes = [16, 8], strides = [1, 1]} : vector<18x8xf32> to vector<16x8xf32>
    %35 = tpu.concatenate %32, %33, %34 in 1 : vector<16x8xf32>, vector<16x8xf32>, vector<16x8xf32> -> vector<16x24xf32>
    %36 = vector.extract_strided_slice %28 {offsets = [16, 0], sizes = [16, 8], strides = [1, 1]} : vector<32x8xf32> to vector<16x8xf32>
    %37 = tpu.concatenate %29, %36, %29 in 0 : vector<1x8xf32>, vector<16x8xf32>, vector<1x8xf32> -> vector<18x8xf32>
    %38 = vector.extract_strided_slice %37 {offsets = [0, 0], sizes = [16, 8], strides = [1, 1]} : vector<18x8xf32> to vector<16x8xf32>
    %39 = vector.extract_strided_slice %37 {offsets = [1, 0], sizes = [16, 8], strides = [1, 1]} : vector<18x8xf32> to vector<16x8xf32>
    %40 = vector.extract_strided_slice %37 {offsets = [2, 0], sizes = [16, 8], strides = [1, 1]} : vector<18x8xf32> to vector<16x8xf32>
    %41 = tpu.concatenate %38, %39, %40 in 1 : vector<16x8xf32>, vector<16x8xf32>, vector<16x8xf32> -> vector<16x24xf32>
    %42 = tpu.concatenate %35, %41 in 0 : vector<16x24xf32>, vector<16x24xf32> -> vector<32x24xf32>
    %c0_8 = arith.constant 0 : index
    %c0_9 = arith.constant 0 : index
    %43 = vector.load %arg3[%c0_8, %c0_9] : memref<24x256xf32, #tpu.memory_space<vmem>>, vector<24x256xf32>
    %cst_10 = arith.constant dense<0.000000e+00> : vector<32x256xf32>
    %44 = tpu.matmul %42, %43, %cst_10 {dimension_numbers = #tpu.dot_dimension_numbers<[1], [0], [0], [1], [0, 0, 1, 1], [], []>} : vector<32x24xf32>, vector<24x256xf32>, vector<32x256xf32> -> vector<32x256xf32>
    %c0_11 = arith.constant 0 : index
    %c0_12 = arith.constant 0 : index
    %45 = vector.load %arg4[%c0_11, %c0_12] : memref<1x256xf32, #tpu.memory_space<vmem>>, vector<1x256xf32>
    %46 = vector.broadcast %45 : vector<1x256xf32> to vector<32x256xf32>
    %47 = arith.addf %44, %46 : vector<32x256xf32>
    %48 = vector.extract_strided_slice %47 {offsets = [0, 0], sizes = [32, 128], strides = [1, 1]} : vector<32x256xf32> to vector<32x128xf32>
    %49 = vector.extract_strided_slice %47 {offsets = [0, 128], sizes = [32, 128], strides = [1, 1]} : vector<32x256xf32> to vector<32x128xf32>
    %50 = arith.negf %49 : vector<32x128xf32>
    %51 = math.exp %50 : vector<32x128xf32>
    %cst_13 = arith.constant 1.000000e+00 : f32
    %52 = vector.broadcast %cst_13 : f32 to vector<32x128xf32>
    %53 = arith.addf %52, %51 : vector<32x128xf32>
    %54 = arith.divf %52, %53 : vector<32x128xf32>
    %55 = arith.mulf %48, %54 : vector<32x128xf32>
    %56 = vector.extract_strided_slice %55 {offsets = [0, 0], sizes = [32, 16], strides = [1, 1]} : vector<32x128xf32> to vector<32x16xf32>
    %cst_14 = arith.constant 0.000000e+00 : f32
    %57 = vector.broadcast %cst_14 : f32 to vector<1x16xf32>
    %58 = vector.extract_strided_slice %56 {offsets = [0, 0], sizes = [16, 16], strides = [1, 1]} : vector<32x16xf32> to vector<16x16xf32>
    %59 = tpu.concatenate %57, %58, %57 in 0 : vector<1x16xf32>, vector<16x16xf32>, vector<1x16xf32> -> vector<18x16xf32>
    %60 = vector.extract_strided_slice %59 {offsets = [0, 0], sizes = [16, 16], strides = [1, 1]} : vector<18x16xf32> to vector<16x16xf32>
    %61 = vector.extract_strided_slice %59 {offsets = [1, 0], sizes = [16, 16], strides = [1, 1]} : vector<18x16xf32> to vector<16x16xf32>
    %62 = vector.extract_strided_slice %59 {offsets = [2, 0], sizes = [16, 16], strides = [1, 1]} : vector<18x16xf32> to vector<16x16xf32>
    %63 = tpu.concatenate %60, %61, %62 in 1 : vector<16x16xf32>, vector<16x16xf32>, vector<16x16xf32> -> vector<16x48xf32>
    %64 = vector.extract_strided_slice %56 {offsets = [16, 0], sizes = [16, 16], strides = [1, 1]} : vector<32x16xf32> to vector<16x16xf32>
    %65 = tpu.concatenate %57, %64, %57 in 0 : vector<1x16xf32>, vector<16x16xf32>, vector<1x16xf32> -> vector<18x16xf32>
    %66 = vector.extract_strided_slice %65 {offsets = [0, 0], sizes = [16, 16], strides = [1, 1]} : vector<18x16xf32> to vector<16x16xf32>
    %67 = vector.extract_strided_slice %65 {offsets = [1, 0], sizes = [16, 16], strides = [1, 1]} : vector<18x16xf32> to vector<16x16xf32>
    %68 = vector.extract_strided_slice %65 {offsets = [2, 0], sizes = [16, 16], strides = [1, 1]} : vector<18x16xf32> to vector<16x16xf32>
    %69 = tpu.concatenate %66, %67, %68 in 1 : vector<16x16xf32>, vector<16x16xf32>, vector<16x16xf32> -> vector<16x48xf32>
    %70 = tpu.concatenate %63, %69 in 0 : vector<16x48xf32>, vector<16x48xf32> -> vector<32x48xf32>
    %c0_15 = arith.constant 0 : index
    %c0_16 = arith.constant 0 : index
    %71 = vector.load %arg5[%c0_15, %c0_16] : memref<48x256xf32, #tpu.memory_space<vmem>>, vector<48x256xf32>
    %cst_17 = arith.constant dense<0.000000e+00> : vector<32x256xf32>
    %72 = tpu.matmul %70, %71, %cst_17 {dimension_numbers = #tpu.dot_dimension_numbers<[1], [0], [0], [1], [0, 0, 1, 1], [], []>} : vector<32x48xf32>, vector<48x256xf32>, vector<32x256xf32> -> vector<32x256xf32>
    %c0_18 = arith.constant 0 : index
    %c0_19 = arith.constant 0 : index
    %73 = vector.load %arg6[%c0_18, %c0_19] : memref<1x256xf32, #tpu.memory_space<vmem>>, vector<1x256xf32>
    %74 = vector.broadcast %73 : vector<1x256xf32> to vector<32x256xf32>
    %75 = arith.addf %72, %74 : vector<32x256xf32>
    %76 = vector.extract_strided_slice %75 {offsets = [0, 0], sizes = [32, 128], strides = [1, 1]} : vector<32x256xf32> to vector<32x128xf32>
    %77 = vector.extract_strided_slice %75 {offsets = [0, 128], sizes = [32, 128], strides = [1, 1]} : vector<32x256xf32> to vector<32x128xf32>
    %78 = arith.negf %77 : vector<32x128xf32>
    %79 = math.exp %78 : vector<32x128xf32>
    %cst_20 = arith.constant 1.000000e+00 : f32
    %80 = vector.broadcast %cst_20 : f32 to vector<32x128xf32>
    %81 = arith.addf %80, %79 : vector<32x128xf32>
    %82 = arith.divf %80, %81 : vector<32x128xf32>
    %83 = arith.mulf %76, %82 : vector<32x128xf32>
    %84 = vector.extract_strided_slice %83 {offsets = [0, 0], sizes = [16, 128], strides = [1, 1]} : vector<32x128xf32> to vector<16x128xf32>
    %cst_21 = arith.constant dense<0.000000e+00> : vector<128xf32>
    %85 = vector.multi_reduction <add>, %84, %cst_21 [0] : vector<16x128xf32> to vector<128xf32>
    %86 = vector.shape_cast %85 : vector<128xf32> to vector<1x128xf32>
    %87 = vector.extract_strided_slice %83 {offsets = [16, 0], sizes = [16, 128], strides = [1, 1]} : vector<32x128xf32> to vector<16x128xf32>
    %cst_22 = arith.constant dense<0.000000e+00> : vector<128xf32>
    %88 = vector.multi_reduction <add>, %87, %cst_22 [0] : vector<16x128xf32> to vector<128xf32>
    %89 = vector.shape_cast %88 : vector<128xf32> to vector<1x128xf32>
    %90 = tpu.concatenate %86, %89 in 0 : vector<1x128xf32>, vector<1x128xf32> -> vector<2x128xf32>
    %cst_23 = arith.constant 6.250000e-02 : f32
    %91 = vector.broadcast %cst_23 : f32 to vector<2x128xf32>
    %92 = arith.mulf %90, %91 : vector<2x128xf32>
    %93 = vector.extract_strided_slice %92 {offsets = [0, 0], sizes = [2, 24], strides = [1, 1]} : vector<2x128xf32> to vector<2x24xf32>
    %c0_24 = arith.constant 0 : index
    %c0_25 = arith.constant 0 : index
    %94 = vector.load %arg7[%c0_24, %c0_25] : memref<24x256xf32, #tpu.memory_space<vmem>>, vector<24x256xf32>
    %cst_26 = arith.constant dense<0.000000e+00> : vector<2x256xf32>
    %95 = tpu.matmul %93, %94, %cst_26 {dimension_numbers = #tpu.dot_dimension_numbers<[1], [0], [0], [1], [0, 0, 1, 1], [], []>} : vector<2x24xf32>, vector<24x256xf32>, vector<2x256xf32> -> vector<2x256xf32>
    %c0_27 = arith.constant 0 : index
    %c0_28 = arith.constant 0 : index
    %96 = vector.load %arg8[%c0_27, %c0_28] : memref<1x256xf32, #tpu.memory_space<vmem>>, vector<1x256xf32>
    %97 = vector.broadcast %96 : vector<1x256xf32> to vector<2x256xf32>
    %98 = arith.addf %95, %97 : vector<2x256xf32>
    %99 = vector.extract_strided_slice %98 {offsets = [0, 0], sizes = [2, 128], strides = [1, 1]} : vector<2x256xf32> to vector<2x128xf32>
    %cst_29 = arith.constant 0.000000e+00 : f32
    %100 = vector.broadcast %cst_29 : f32 to vector<2x128xf32>
    %101 = arith.maximumf %99, %100 : vector<2x128xf32>
    %102 = vector.extract_strided_slice %98 {offsets = [0, 128], sizes = [2, 128], strides = [1, 1]} : vector<2x256xf32> to vector<2x128xf32>
    %cst_30 = arith.constant 0.000000e+00 : f32
    %103 = vector.broadcast %cst_30 : f32 to vector<2x128xf32>
    %104 = arith.maximumf %102, %103 : vector<2x128xf32>
    %c0_31 = arith.constant 0 : index
    %c0_32 = arith.constant 0 : index
    %105 = vector.load %arg9[%c0_31, %c0_32] : memref<2x128xf32, #tpu.memory_space<vmem>>, vector<2x128xf32>
    %cst_33 = arith.constant 5.000000e-01 : f32
    %106 = vector.broadcast %cst_33 : f32 to vector<2x128xf32>
    %107 = arith.mulf %106, %104 : vector<2x128xf32>
    %108 = math.exp %107 : vector<2x128xf32>
    %109 = arith.mulf %105, %108 : vector<2x128xf32>
    %110 = arith.addf %109, %101 : vector<2x128xf32>
    %cst_34 = arith.constant 0.000000e+00 : f32
    %111 = vector.broadcast %cst_34 : f32 to vector<2x128xf32>
    %112 = tpu.concatenate %110, %101, %104, %111 in 0 : vector<2x128xf32>, vector<2x128xf32>, vector<2x128xf32>, vector<2x128xf32> -> vector<8x128xf32>
    %c0_35 = arith.constant 0 : index
    %c0_36 = arith.constant 0 : index
    %113 = vector.load %arg10[%c0_35, %c0_36] : memref<8x128xf32, #tpu.memory_space<vmem>>, vector<8x128xf32>
    tpu.vector_store %arg10[%c0_35, %c0_36], %112 {strides = array<i32>} : memref<8x128xf32, #tpu.memory_space<vmem>>, vector<8x128xf32>,
    return
  }
}

</mosaic_0001>

<bundles_post_ra>
// kernel: cnn_forward.1
= control target key start
LH: loop header
LB: loop body
LE: loop exit
PB: predicated region body
PF: predicated region fallthrough
CT: control target
= control target key end

     0   :  { %15 = vsyncpa [#allocation3], 0  ;;  %s1685_s0 = inlined_call_operand.hbm [shape: f32[32,128], index: 0, kind: input, shape index: {}]   ;;  %s1686_s1 = inlined_call_operand.hbm [shape: f32[384,256], index: 1, kind: input, shape index: {}]   ;;  %s1687_s2 = inlined_call_operand.vmem [shape: f32[1,256], index: 2, kind: input, shape index: {}]   ;;  %s1688_s3 = inlined_call_operand.hbm [shape: f32[24,256], index: 3, kind: input, shape index: {}]   ;;  %s1689_s4 = inlined_call_operand.vmem [shape: f32[1,256], index: 4, kind: input, shape index: {}]   ;;  %s1690_s5 = inlined_call_operand.hbm [shape: f32[48,256], index: 5, kind: input, shape index: {}]   ;;  %s1691_s6 = inlined_call_operand.vmem [shape: f32[1,256], index: 6, kind: input, shape index: {}]   ;;  %s1692_s7 = inlined_call_operand.hbm [shape: f32[24,256], index: 7, kind: input, shape index: {}]   ;;  %s1693_s8 = inlined_call_operand.vmem [shape: f32[1,256], index: 8, kind: input, shape index: {}]   ;;  %s1694_s9 = inlined_call_operand.vmem [shape: f32[2,128], index: 9, kind: input, shape index: {}]   ;;  %s1695_s10 = inlined_call_operand.vmem [shape: f32[8,128], index: 10, kind: output, shape index: {}]  }
   0x1   :  { %16 = vsyncpa [#allocation5], 0 }
   0x2   :  { %17 = vsyncpa [#allocation8], 0  ;;  %s1402_s13 = smov [#allocation4]   ;;  %s1286_s17 = scalar_lea.hbm %s1686_s1, 12288 }
   0x3   :  { %s35_s14 = sshll.u32 %s1402_s13, 4  ;;  %p1287_p0 = scmp.ne.s32.totalorder %s1686_s1, %s1286_s17  ;;  %s36_s14 = int_to_ptr.vmem [resolvable:$true] %s35_s14 }
   0x4   :  { %p1290_p1 = scmp.lt.u32.totalorder %s1286_s17, %s1686_s1 }
   0x6   :  { %p1292_p2 = pnand %p1290_p1, %p1287_p0 }
   0x8   :  { %1295 = shalt.err (!%p1292_p2)
}
   0x9   :  { %s1296_s22 = scalar_lea.vmem %s36_s14, 12288  ;;  %p1301_p4 = scmp.lt.s32.totalorder %s36_s14, %s36_s14 }
   0xa   :  { %p1297_p3 = scmp.ne.s32.totalorder %s36_s14, %s1296_s22  ;;  %p1302_p5 = scmp.lt.s32.totalorder %s1296_s22, %s1296_s22 }
   0xc   :  { %p1303_p6 = por %p1302_p5, %p1301_p4 }
   0xe   :  { %p1304_p7 = pnand %p1303_p6, %p1297_p3 }
  0x10   :  { %1307 = shalt.err (!%p1304_p7)
}
  0x11   :  { %s1403_s23 = smov 256   ;;  %s1404_s24 = smov 16  }
  0x12   :  { %41 = dma.hbm_to_vmem [thread:$0]  %s1686_s1, 12288, %s36_s14, [#allocation5], %s1403_s23, %s1403_s23, %s1404_s24  }
  0x13   :  { %s1405_s27 = smov [#allocation7]   ;;  %s1406_s29 = smov [#allocation2]  }
  0x14   :  { %s63_s28 = sshll.u32 %s1405_s27, 4  ;;  %s23_s30 = sshll.u32 %s1406_s29, 4  ;;  %s64_s28 = int_to_ptr.vmem [resolvable:$true] %s63_s28  ;;  %s24_s30 = int_to_ptr.vmem [resolvable:$true] %s23_s30 }
  0x15   :  { %s1308_s13 = scalar_lea.hbm %s1690_s5, 1536 }
  0x16   :  { %p1309_p8 = scmp.ne.s32.totalorder %s1690_s5, %s1308_s13  ;;  %p1312_p9 = scmp.lt.u32.totalorder %s1308_s13, %s1690_s5 }
  0x18   :  { %p1314_p10 = pnand %p1312_p9, %p1309_p8 }
  0x1a   :  { %1317 = shalt.err (!%p1314_p10)
}
  0x1b   :  { %s1318_s1 = scalar_lea.vmem %s64_s28, 1536  ;;  %p1323_p12 = scmp.lt.s32.totalorder %s64_s28, %s64_s28 }
  0x1c   :  { %p1319_p11 = scmp.ne.s32.totalorder %s64_s28, %s1318_s1  ;;  %p1324_p13 = scmp.lt.s32.totalorder %s1318_s1, %s1318_s1 }
  0x1e   :  { %p1325_p0 = por %p1324_p13, %p1323_p12 }
  0x20   :  { %p1326_p1 = pnand %p1325_p0, %p1319_p11 }
  0x22   :  { %1329 = shalt.err (!%p1326_p1)
}
  0x23   :  { %69 = dma.hbm_to_vmem [thread:$0]  %s1690_s5, 1536, %s64_s28, [#allocation8], %s1403_s23, %s1403_s23, %s1404_s24  }
  0x24   :  { %s1330_s22 = scalar_lea.hbm %s1685_s0, 512 }
  0x25   :  { %p1331_p2 = scmp.ne.s32.totalorder %s1685_s0, %s1330_s22  ;;  %p1334_p3 = scmp.lt.u32.totalorder %s1330_s22, %s1685_s0 }
  0x27   :  { %p1336_p4 = pnand %p1334_p3, %p1331_p2 }
  0x29   :  { %1339 = shalt.err (!%p1336_p4)
}
  0x2a   :  { %s1340_s11 = scalar_lea.vmem %s24_s30, 512  ;;  %p1345_p6 = scmp.lt.s32.totalorder %s24_s30, %s24_s30 }
  0x2b   :  { %p1341_p5 = scmp.ne.s32.totalorder %s24_s30, %s1340_s11  ;;  %p1346_p7 = scmp.lt.s32.totalorder %s1340_s11, %s1340_s11 }
  0x2d   :  { %p1347_p8 = por %p1346_p7, %p1345_p6 }
  0x2f   :  { %p1348_p9 = pnand %p1347_p8, %p1341_p5 }
  0x31   :  { %1351 = shalt.err (!%p1348_p9)
}
  0x32   :  { %s1407_s5 = smov 128   ;;  %s1408_s28 = smov 8  }
  0x33   :  { %29 = dma.hbm_to_vmem [thread:$0]  %s1685_s0, 512, %s24_s30, [#allocation3], %s1407_s5, %s1407_s5, %s1408_s28  }
  0x34   :  { %s1409_s15 = smov [#allocation6]   ;;  %s1410_s17 = smov [#allocation9]  }
  0x35   :  { %s49_s16 = sshll.u32 %s1409_s15, 4  ;;  %s77_s18 = sshll.u32 %s1410_s17, 4  ;;  %s50_s16 = int_to_ptr.vmem [resolvable:$true] %s49_s16  ;;  %s78_s18 = int_to_ptr.vmem [resolvable:$true] %s77_s18 }
  0x36   :  { %s1352_s19 = scalar_lea.hbm %s1688_s3, 768 }
  0x37   :  { %p1353_p10 = scmp.ne.s32.totalorder %s1688_s3, %s1352_s19  ;;  %p1356_p11 = scmp.lt.u32.totalorder %s1352_s19, %s1688_s3 }
  0x39   :  { %p1358_p12 = pnand %p1356_p11, %p1353_p10 }
  0x3b   :  { %1361 = shalt.err (!%p1358_p12)
}
  0x3c   :  { %s1362_s0 = scalar_lea.vmem %s50_s16, 768  ;;  %p1367_p0 = scmp.lt.s32.totalorder %s50_s16, %s50_s16 }
  0x3d   :  { %p1363_p13 = scmp.ne.s32.totalorder %s50_s16, %s1362_s0  ;;  %p1368_p1 = scmp.lt.s32.totalorder %s1362_s0, %s1362_s0 }
  0x3f   :  { %p1369_p2 = por %p1368_p1, %p1367_p0 }
  0x41   :  { %p1370_p3 = pnand %p1369_p2, %p1363_p13 }
  0x43   :  { %1373 = shalt.err (!%p1370_p3)
}
  0x44   :  { %55 = dma.hbm_to_vmem [thread:$0]  %s1688_s3, 768, %s50_s16, [#allocation5], %s1403_s23, %s1403_s23, %s1404_s24  }
  0x45   :  { %s1374_s11 = scalar_lea.hbm %s1692_s7, 768 }
  0x46   :  { %p1375_p4 = scmp.ne.s32.totalorder %s1692_s7, %s1374_s11  ;;  %p1378_p5 = scmp.lt.u32.totalorder %s1374_s11, %s1692_s7 }
  0x48   :  { %p1380_p6 = pnand %p1378_p5, %p1375_p4 }
  0x4a   :  { %1383 = shalt.err (!%p1380_p6)
}
  0x4b   :  { %s1384_s17 = scalar_lea.vmem %s78_s18, 768  ;;  %p1389_p8 = scmp.lt.s32.totalorder %s78_s18, %s78_s18 }
  0x4c   :  { %p1385_p7 = scmp.ne.s32.totalorder %s78_s18, %s1384_s17  ;;  %p1390_p9 = scmp.lt.s32.totalorder %s1384_s17, %s1384_s17 }
  0x4e   :  { %p1391_p10 = por %p1390_p9, %p1389_p8 }
  0x50   :  { %p1392_p11 = pnand %p1391_p10, %p1385_p7 }
  0x52   :  { %1395 = shalt.err (!%p1392_p11)
}
  0x53   :  { %83 = dma.hbm_to_vmem [thread:$0]  %s1692_s7, 768, %s78_s18, [#allocation8], %s1403_s23, %s1403_s23, %s1404_s24  }
  0x54   :  { %1396 = dma.done.wait [#allocation3], 512  }
  0x55   :  { %1397 = vsyncadd [#allocation3], 4294966784 }
  0x56   :  { %1398 = dma.done.wait [#allocation5], 13056  }
  0x57   :  { %1399 = vsyncadd [#allocation5], 4294954240 }
  0x58   :  { %1400 = dma.done.wait [#allocation8], 2304  }
  0x59   :  { %1401 = vsyncadd [#allocation8], 4294964992  ;;  %v1411_v0 = vmov 0.0   ;;  %v163_v1 = vld [vmem:[#allocation4 + $0x8] sm:$0xff]  ;;  %v165_v2 = vld [vmem:[#allocation4 + $0x18] sm:$0xff]  ;;  %vm109_vm0 = vcmask 1040384  }
  0x5a   :  { %423 = vmatprep.mubr.f32.mxu1 %v1411_v0  ;;  %v162_v3 = vld [vmem:[#allocation4] sm:$0xff]  ;;  %v1093_v4 = vpack.c.bf16 %v165_v2, %v163_v1  ;;  %v164_v5 = vld [vmem:[#allocation4 + $0x10] sm:$0xff]  ;;  %v167_v6 = vld [vmem:[#allocation4 + $0x28] sm:$0xff]  ;;  %vm120_vm1 = vcmask 1046528   ;;  %vm128_vm2 = vcmask 1045504   ;;  %vm510_vm4 = vcmask 64512  }
  0x5b   :  { %v169_v7 = vld [vmem:[#allocation4 + $0x38] sm:$0xff]  ;;  %v1095_v8 = vpack.c.bf16 %v164_v5, %v162_v3  ;;  %v166_v10 = vld [vmem:[#allocation4 + $0x20] sm:$0xff]  ;;  %v168_v11 = vld [vmem:[#allocation4 + $0x30] sm:$0xff]  ;;  %vm513_vm5 = vcmask 130048   ;;  %vm572_vm6 = vcmask 195584   ;;  %vm738_vm7 = vcmask 261120  }
  0x5c   :  { %v1097_v9 = vpack.c.bf16 %v169_v7, %v167_v6  ;;  %v171_v12 = vld [vmem:[#allocation4 + $0x48] sm:$0xff]  ;;  %1094 = vmatprep.subr.bf16.mxu0 %v1093_v4  ;;  %v173_v13 = vld [vmem:[#allocation4 + $0x58] sm:$0xff]  ;;  %v1099_v14 = vpack.c.bf16 %v168_v11, %v166_v10  ;;  %v170_v16 = vld [vmem:[#allocation4 + $0x40] sm:$0xff]  ;;  %vm803_vm8 = vcmask 392192   ;;  %vm1055_vm9 = vcmask 1041408  }
  0x5d   :  { %1096 = vmatpush1.bf16.msra.mxu0 %v1095_v8  ;;  %v1101_v15 = vpack.c.bf16 %v173_v13, %v171_v12  ;;  %v172_v17 = vld [vmem:[#allocation4 + $0x50] sm:$0xff]  ;;  %v175_v18 = vld [vmem:[#allocation4 + $0x68] sm:$0xff]  ;;  %v177_v19 = vld [vmem:[#allocation4 + $0x78] sm:$0xff]  ;;  %vm1057_vm10 = vcmask 1043456  }
  0x5e   :  { %1098 = vmatprep.subr.bf16.mxu0 %v1097_v9  ;;  %v1103_v20 = vpack.c.bf16 %v172_v17, %v170_v16  ;;  %v1105_v21 = vpack.c.bf16 %v177_v19, %v175_v18  ;;  %v174_v22 = vld [vmem:[#allocation4 + $0x60] sm:$0xff]  ;;  %v176_v23 = vld [vmem:[#allocation4 + $0x70] sm:$0xff]  ;;  %v179_v24 = vld [vmem:[#allocation4 + $0x88] sm:$0xff] }
  0x5f   :  { %v181_v25 = vld [vmem:[#allocation4 + $0x98] sm:$0xff]  ;;  %v1107_v26 = vpack.c.bf16 %v176_v23, %v174_v22  ;;  %v227_v27 = vld [vmem:[#allocation4 + $0x208] sm:$0xff]  ;;  %v226_v29 = vld [vmem:[#allocation4 + $0x200] sm:$0xff] }
  0x60   :  { %v229_v28 = vld [vmem:[#allocation4 + $0x218] sm:$0xff]  ;;  %v1109_v30 = vpack.c.bf16 %v181_v25, %v179_v24  ;;  %v178_v31 = vld [vmem:[#allocation4 + $0x80] sm:$0xff]  ;;  %v180_v32 = vld [vmem:[#allocation4 + $0x90] sm:$0xff] }
  0x61   :  { %1100 = vmatpush1.bf16.msra.mxu0 %v1099_v14  ;;  %v1157_v33 = vpack.c.bf16 %v229_v28, %v227_v27  ;;  %v228_v34 = vld [vmem:[#allocation4 + $0x210] sm:$0xff]  ;;  %v183_v35 = vld [vmem:[#allocation4 + $0xa8] sm:$0xff]  ;;  %v185_v36 = vld [vmem:[#allocation4 + $0xb8] sm:$0xff]  ;;  %v1111_v42 = vpack.c.bf16 %v180_v32, %v178_v31 }
  0x62   :  { %1102 = vmatprep.subr.bf16.mxu0 %v1101_v15  ;;  %v1159_v37 = vpack.c.bf16 %v228_v34, %v226_v29  ;;  %v231_v38 = vld [vmem:[#allocation4 + $0x228] sm:$0xff]  ;;  %v233_v39 = vld [vmem:[#allocation4 + $0x238] sm:$0xff]  ;;  %v230_v40 = vld [vmem:[#allocation4 + $0x220] sm:$0xff]  ;;  %v1113_v47 = vpack.c.bf16 %v185_v36, %v183_v35 }
  0x63   :  { %1158 = vmatprep.subr.bf16.mxu1 %v1157_v33  ;;  %v232_v41 = vld [vmem:[#allocation4 + $0x230] sm:$0xff]  ;;  %v182_v43 = vld [vmem:[#allocation4 + $0xa0] sm:$0xff]  ;;  %v1161_v45 = vpack.c.bf16 %v233_v39, %v231_v38  ;;  %v187_v48 = vld [vmem:[#allocation4 + $0xc8] sm:$0xff] }
  0x64   :  { %v184_v44 = vld [vmem:[#allocation4 + $0xb0] sm:$0xff]  ;;  %1160 = vmatpush1.bf16.msra.mxu1 %v1159_v37  ;;  %v1163_v46 = vpack.c.bf16 %v232_v41, %v230_v40  ;;  %v235_v49 = vld [vmem:[#allocation4 + $0x248] sm:$0xff]  ;;  %v237_v50 = vld [vmem:[#allocation4 + $0x258] sm:$0xff] }
  0x65   :  { %1104 = vmatpush1.bf16.msra.mxu0 %v1103_v20  ;;  %v189_v51 = vld [vmem:[#allocation4 + $0xd8] sm:$0xff]  ;;  %1162 = vmatprep.subr.bf16.mxu1 %v1161_v45  ;;  %v1165_v52 = vpack.c.bf16 %v237_v50, %v235_v49  ;;  %v234_v53 = vld [vmem:[#allocation4 + $0x240] sm:$0xff]  ;;  %v236_v54 = vld [vmem:[#allocation4 + $0x250] sm:$0xff]  ;;  %v1115_v55 = vpack.c.bf16 %v184_v44, %v182_v43 }
  0x66   :  { %1106 = vmatprep.subr.bf16.mxu0 %v1105_v21  ;;  %v186_v56 = vld [vmem:[#allocation4 + $0xc0] sm:$0xff]  ;;  %v1167_v57 = vpack.c.bf16 %v236_v54, %v234_v53  ;;  %v239_v58 = vld [vmem:[#allocation4 + $0x268] sm:$0xff]  ;;  %v241_v59 = vld [vmem:[#allocation4 + $0x278] sm:$0xff]  ;;  %v1117_v60 = vpack.c.bf16 %v189_v51, %v187_v48 }
  0x67   :  { %v188_v61 = vld [vmem:[#allocation4 + $0xd0] sm:$0xff]  ;;  %v1169_v62 = vpack.c.bf16 %v241_v59, %v239_v58  ;;  %v238_v63 = vld [vmem:[#allocation4 + $0x260] sm:$0xff]  ;;  %v191_v2 = vld [vmem:[#allocation4 + $0xe8] sm:$0xff] }
  0x68   :  { %1164 = vmatpush1.bf16.msra.mxu1 %v1163_v46  ;;  %v240_v1 = vld [vmem:[#allocation4 + $0x270] sm:$0xff]  ;;  %v193_v3 = vld [vmem:[#allocation4 + $0xf8] sm:$0xff]  ;;  %v243_v4 = vld [vmem:[#allocation4 + $0x288] sm:$0xff]  ;;  %v1119_v6 = vpack.c.bf16 %v188_v61, %v186_v56 }
  0x69   :  { %1108 = vmatpush1.bf16.msra.mxu0 %v1107_v26  ;;  %1166 = vmatprep.subr.bf16.mxu1 %v1165_v52  ;;  %v245_v5 = vld [vmem:[#allocation4 + $0x298] sm:$0xff]  ;;  %v190_v7 = vld [vmem:[#allocation4 + $0xe0] sm:$0xff]  ;;  %v192_v8 = vld [vmem:[#allocation4 + $0xf0] sm:$0xff]  ;;  %v1171_v9 = vpack.c.bf16 %v240_v1, %v238_v63  ;;  %v1121_v10 = vpack.c.bf16 %v193_v3, %v191_v2 }
  0x6a   :  { %1110 = vmatprep.subr.bf16.mxu0 %v1109_v30  ;;  %v195_v11 = vld [vmem:[#allocation4 + $0x108] sm:$0xff]  ;;  %v1173_v12 = vpack.c.bf16 %v245_v5, %v243_v4  ;;  %v242_v13 = vld [vmem:[#allocation4 + $0x280] sm:$0xff]  ;;  %v244_v14 = vld [vmem:[#allocation4 + $0x290] sm:$0xff]  ;;  %v1123_v18 = vpack.c.bf16 %v192_v8, %v190_v7 }
  0x6b   :  { %v197_v15 = vld [vmem:[#allocation4 + $0x118] sm:$0xff]  ;;  %v247_v16 = vld [vmem:[#allocation4 + $0x2a8] sm:$0xff]  ;;  %v194_v19 = vld [vmem:[#allocation4 + $0x100] sm:$0xff]  ;;  %v1175_v21 = vpack.c.bf16 %v244_v14, %v242_v13 }
  0x6c   :  { %1168 = vmatpush1.bf16.msra.mxu1 %v1167_v57  ;;  %v249_v17 = vld [vmem:[#allocation4 + $0x2b8] sm:$0xff]  ;;  %v196_v20 = vld [vmem:[#allocation4 + $0x110] sm:$0xff]  ;;  %v1125_v22 = vpack.c.bf16 %v197_v15, %v195_v11  ;;  %v199_v23 = vld [vmem:[#allocation4 + $0x128] sm:$0xff] }
  0x6d   :  { %1112 = vmatpush1.bf16.msra.mxu0 %v1111_v42  ;;  %1170 = vmatprep.subr.bf16.mxu1 %v1169_v62  ;;  %v1177_v24 = vpack.c.bf16 %v249_v17, %v247_v16  ;;  %v246_v25 = vld [vmem:[#allocation4 + $0x2a0] sm:$0xff]  ;;  %v248_v26 = vld [vmem:[#allocation4 + $0x2b0] sm:$0xff]  ;;  %v201_v27 = vld [vmem:[#allocation4 + $0x138] sm:$0xff]  ;;  %v1127_v31 = vpack.c.bf16 %v196_v20, %v194_v19 }
  0x6e   :  { %1114 = vmatprep.subr.bf16.mxu0 %v1113_v47  ;;  %v251_v28 = vld [vmem:[#allocation4 + $0x2c8] sm:$0xff]  ;;  %v253_v29 = vld [vmem:[#allocation4 + $0x2d8] sm:$0xff]  ;;  %v198_v30 = vld [vmem:[#allocation4 + $0x120] sm:$0xff]  ;;  %v1179_v33 = vpack.c.bf16 %v248_v26, %v246_v25  ;;  %v1129_v36 = vpack.c.bf16 %v201_v27, %v199_v23 }
  0x6f   :  { %v200_v32 = vld [vmem:[#allocation4 + $0x130] sm:$0xff]  ;;  %v103_v34 = vld [vmem:[#allocation2] sm:$0xff]  ;;  %v104_v35 = vld [vmem:[#allocation2 + $0x8] sm:$0xff]  ;;  %v1181_v38 = vpack.c.bf16 %v253_v29, %v251_v28 }
  0x70   :  { %1172 = vmatpush1.bf16.msra.mxu1 %v1171_v9  ;;  %v203_v37 = vld [vmem:[#allocation4 + $0x148] sm:$0xff]  ;;  %v250_v39 = vld [vmem:[#allocation4 + $0x2c0] sm:$0xff]  ;;  %v252_v40 = vld [vmem:[#allocation4 + $0x2d0] sm:$0xff]  ;;  %v1542_v41 = vrot.slane %v103_v34, 7  ;;  %v111_v42 = vrot.slane %v104_v35, 7  ;;  %v1131_v48 = vpack.c.bf16 %v200_v32, %v198_v30 }
  0x71   :  { %1116 = vmatpush1.bf16.msra.mxu0 %v1115_v55  ;;  %1174 = vmatprep.subr.bf16.mxu1 %v1173_v12  ;;  %v205_v43 = vld [vmem:[#allocation4 + $0x158] sm:$0xff]  ;;  %v255_v44 = vld [vmem:[#allocation4 + $0x2e8] sm:$0xff]  ;;  %v202_v49 = vld [vmem:[#allocation4 + $0x140] sm:$0xff]  ;;  %v1183_v50 = vpack.c.bf16 %v252_v40, %v250_v39 }
  0x72   :  { %1118 = vmatprep.subr.bf16.mxu0 %v1117_v60  ;;  %v257_v45 = vld [vmem:[#allocation4 + $0x2f8] sm:$0xff]  ;;  %v1546_v46 = vsel %vm109_vm0, %v1542_v41, %v111_v42  ;;  %v116_v47 = vsel %vm109_vm0, 0.0, %v1542_v41  ;;  %v1133_v53 = vpack.c.bf16 %v205_v43, %v203_v37  ;;  %v204_v54 = vld [vmem:[#allocation4 + $0x150] sm:$0xff]  ;;  %v254_v56 = vld [vmem:[#allocation4 + $0x2e0] sm:$0xff]  ;;  %v117_v9 = vsel %vm109_vm0, %v111_v42, 0.0 }
  0x73   :  { %v121_v51 = vrot.slane %v116_v47, 1  ;;  %v122_v52 = vrot.slane %v1546_v46, 1  ;;  %v1185_v55 = vpack.c.bf16 %v257_v45, %v255_v44  ;;  %v256_v57 = vld [vmem:[#allocation4 + $0x2f0] sm:$0xff]  ;;  %v207_v58 = vld [vmem:[#allocation4 + $0x168] sm:$0xff]  ;;  %v209_v59 = vld [vmem:[#allocation4 + $0x178] sm:$0xff]  ;;  %v1135_v61 = vpack.c.bf16 %v204_v54, %v202_v49 }
  0x74   :  { %1176 = vmatpush1.bf16.msra.mxu1 %v1175_v21  ;;  %v1187_v62 = vpack.c.bf16 %v256_v57, %v254_v56  ;;  %v129_v63 = vrot.slane %v116_v47, 2  ;;  %v130_v1 = vrot.slane %v1546_v46, 2  ;;  %v105_v2 = vld [vmem:[#allocation2 + $0x10] sm:$0xff]  ;;  %v106_v3 = vld [vmem:[#allocation2 + $0x18] sm:$0xff]  ;;  %v1137_v4 = vpack.c.bf16 %v209_v59, %v207_v58  ;;  %v206_v5 = vld [vmem:[#allocation4 + $0x160] sm:$0xff] }
  0x75   :  { %1120 = vmatpush1.bf16.msra.mxu0 %v1119_v6  ;;  %1178 = vmatprep.subr.bf16.mxu1 %v1177_v24  ;;  %v123_v60 = vsel %vm120_vm1, %v121_v51, %v122_v52  ;;  %v208_v6 = vld [vmem:[#allocation4 + $0x170] sm:$0xff]  ;;  %v211_v7 = vld [vmem:[#allocation4 + $0x188] sm:$0xff]  ;;  %v213_v8 = vld [vmem:[#allocation4 + $0x198] sm:$0xff]  ;;  %v139_v11 = vrot.slane %v106_v3, 7  ;;  %v132_v14 = vrot.slane %v117_v9, 2 }
  0x76   :  { %1122 = vmatprep.subr.bf16.mxu0 %v1121_v10  ;;  %334 = vmatprep.mubr.f32.mxu0 %v123_v60  ;;  %v1556_v10 = vrot.slane %v105_v2, 7  ;;  %v1139_v12 = vpack.c.bf16 %v208_v6, %v206_v5  ;;  %v131_v13 = vsel %vm128_vm2, %v129_v63, %v130_v1  ;;  %v1141_v15 = vpack.c.bf16 %v213_v8, %v211_v7  ;;  %v210_v16 = vld [vmem:[#allocation4 + $0x180] sm:$0xff]  ;;  %v212_v17 = vld [vmem:[#allocation4 + $0x190] sm:$0xff]  ;;  %v217_v19 = vld [vmem:[#allocation4 + $0x1b8] sm:$0xff] }
  0x77   :  { %v133_v23 = vsel %vm128_vm2, %v130_v1, %v132_v14  ;;  %v214_v27 = vld [vmem:[#allocation4 + $0x1a0] sm:$0xff]  ;;  %v216_v28 = vld [vmem:[#allocation4 + $0x1b0] sm:$0xff]  ;;  %v219_v29 = vld [vmem:[#allocation4 + $0x1c8] sm:$0xff]  ;;  %v260_v1 = vlaneseq }
  0x78   :  { %1180 = vmatpush1.bf16.msra.mxu1 %v1179_v33  ;;  %v140_v20 = vsel %vm109_vm0, %v1556_v10, %v139_v11  ;;  %v144_v21 = vsel %vm109_vm0, 0.0, %v1556_v10  ;;  %v221_v30 = vld [vmem:[#allocation4 + $0x1d8] sm:$0xff]  ;;  %v1147_v32 = vpack.c.bf16 %v216_v28, %v214_v27  ;;  %v220_v37 = vld [vmem:[#allocation4 + $0x1d0] sm:$0xff]  ;;  %v222_v44 = vld [vmem:[#allocation4 + $0x1e0] sm:$0xff] }
  0x79   :  { %1124 = vmatpush1.bf16.msra.mxu0 %v1123_v18  ;;  %1182 = vmatprep.subr.bf16.mxu1 %v1181_v38  ;;  %v215_v18 = vld [vmem:[#allocation4 + $0x1a8] sm:$0xff]  ;;  %v155_v24 = vrot.slane %v144_v21, 2  ;;  %v156_v25 = vrot.slane %v140_v20, 2  ;;  %v1149_v35 = vpack.c.bf16 %v221_v30, %v219_v29  ;;  %v225_v39 = vld [vmem:[#allocation4 + $0x1f8] sm:$0xff]  ;;  %v224_v45 = vld [vmem:[#allocation4 + $0x1f0] sm:$0xff]  ;;  %v149_v51 = vrot.slane %v140_v20, 1 }
  0x7a   :  { %1126 = vmatprep.subr.bf16.mxu0 %v1125_v22  ;;  %v1143_v22 = vpack.c.bf16 %v212_v17, %v210_v16  ;;  %v1145_v26 = vpack.c.bf16 %v217_v19, %v215_v18  ;;  %v223_v38 = vld [vmem:[#allocation4 + $0x1e8] sm:$0xff]  ;;  %v1155_v47 = vpack.c.bf16 %v224_v45, %v222_v44  ;;  %vm1068_vm3 = vmneg %vm109_vm0  ;;  %v557_v57 = vld [vmem:[#allocation6 + $0x18] sm:$0xff] }
  0x7b   :  { %v157_v33 = vsel %vm128_vm2, %v155_v24, %v156_v25  ;;  %v1153_v43 = vpack.c.bf16 %v225_v39, %v223_v38  ;;  %v555_v56 = vld [vmem:[#allocation6 + $0x8] sm:$0xff]  ;;  %v556_v59 = vld [vmem:[#allocation6 + $0x10] sm:$0xff] }
  0x7c   :  { %1184 = vmatpush1.bf16.msra.mxu1 %v1183_v50  ;;  %v148_v50 = vrot.slane %v144_v21, 1  ;;  %v1189_v58 = vpack.c.bf16 %v557_v57, %v555_v56 }
  0x7d   :  { %1128 = vmatpush1.bf16.msra.mxu0 %v1127_v31  ;;  %1186 = vmatprep.subr.bf16.mxu1 %v1185_v55  ;;  %v145_v31 = vsel %vm109_vm0, %v139_v11, 0.0 }
  0x7e   :  { %1130 = vmatprep.subr.bf16.mxu0 %v1129_v36  ;;  %v158_v34 = vrot.slane %v145_v31, 2  ;;  %v218_v36 = vld [vmem:[#allocation4 + $0x1c0] sm:$0xff]  ;;  %v151_v54 = vrot.slane %v145_v31, 1 }
  0x7f   :  { %v1151_v40 = vpack.c.bf16 %v220_v37, %v218_v36 }
  0x80   :  { %1188 = vmatpush1.bf16.msra.mxu1 %v1187_v62  ;;  %v159_v42 = vsel %vm128_vm2, %v156_v25, %v158_v34  ;;  %v152_v55 = vsel %vm120_vm1, %v149_v51, %v151_v54 }
  0x81   :  { %1132 = vmatpush1.bf16.msra.mxu0 %v1131_v48  ;;  %v124_v48 = vrot.slane %v117_v9, 1  ;;  %1190 = vmatprep.subr.bf16.mxu1 %v1189_v58  ;;  %v258_v9 = vld [vmem:[%s1687_s2] sm:$0x3] }
  0x82   :  { %1134 = vmatprep.subr.bf16.mxu0 %v1133_v53  ;;  %v150_v53 = vsel %vm120_vm1, %v148_v50, %v149_v51 }
  0x83   :  { %424 = vmatmul.mubr.f32.vlgmr.msra.gmra.mrb[0].mxu1 %v131_v13  ;;  %v125_v49 = vsel %vm120_vm1, %v122_v52, %v124_v48  ;;  %v554_v52 = vld [vmem:[#allocation6] sm:$0xff] }
  0x84   :  { %429 = vmatprep.mubr.f32.mxu1 %v1411_v0  ;;  %v1191_v60 = vpack.c.bf16 %v556_v59, %v554_v52 }
  0x85   :  { %1136 = vmatpush1.bf16.msra.mxu0 %v1135_v61  ;;  %v558_v61 = vld [vmem:[#allocation6 + $0x20] sm:$0xff] }
  0x86   :  { %1138 = vmatprep.subr.bf16.mxu0 %v1137_v4  ;;  %1192 = vmatpush1.bf16.msra.mxu1 %v1191_v60  ;;  %v261_v4 = vshrl.u32 %v260_v1, 7 }
  0x87   :  { %430 = vmatmul.mubr.f32.gmra.mrb[2].mxu1 %v133_v23 }
  0x88   :  { %435 = vmatprep.mubr.f32.mxu1 %v1411_v0  ;;  %v1580_v7 = vsub.s32 0, %v261_v4 }
  0x89   :  { %1140 = vmatpush1.bf16.msra.mxu0 %v1139_v12 }
  0x8a   :  { %1142 = vmatprep.subr.bf16.mxu0 %v1141_v15  ;;  %v263_v11 = vrot.slane %v258_v9, %v1580_v7 }
  0x8b   :  { %436 = vmatmul.mubr.f32.gmra.mrb[4].mxu1 %v157_v33 }
  0x8c   :  { %441 = vmatprep.mubr.f32.mxu1 %v1411_v0 }
  0x8d   :  { %1144 = vmatpush1.bf16.msra.mxu0 %v1143_v22 }
  0x8e   :  { %1146 = vmatprep.subr.bf16.mxu0 %v1145_v26 }
  0x8f   :  { %442 = vmatmul.mubr.f32.gmra.mrb[6].mxu1 %v159_v42 }
  0x90   :  { %649 = vmatprep.mubr.f32.mxu1 %v1411_v0 }
  0x91   :  { %1148 = vmatpush1.bf16.msra.mxu0 %v1147_v32 }
  0x92   :  { %1150 = vmatprep.subr.bf16.mxu0 %v1149_v35 }
  0x95   :  { %1152 = vmatpush1.bf16.msra.mxu0 %v1151_v40 }
  0x96   :  { %1154 = vmatprep.subr.bf16.mxu0 %v1153_v43 }
  0x99   :  { %1156 = vmatpush1.bf16.msra.mxu0 %v1155_v47 }
  0x9c   :  { %1069 = vmatmul.mubr.msk.f32.vlgmr.msra.gmra.mrb[0].mxu0 %vm1068_vm3, %v1542_v41  ;;  %v559_v41 = vld [vmem:[#allocation6 + $0x28] sm:$0xff] }
  0x9d   :  { %340 = vmatprep.mubr.f32.mxu0 %v125_v49  ;;  %589 = vmatprep.subr.mxu1 %v559_v41 }
  0x9e   :  { %590 = vmatpush1.msra.mxu1 %v558_v61 }
  0xa0   :  { %341 = vmatmul.mubr.f32.gmra.mrb[2].mxu0 %v1546_v46 }
  0xa1   :  { %346 = vmatprep.mubr.f32.mxu0 %v150_v53 }
  0xa4   :  { %1071 = vmatmul.mubr.msk.f32.gmra.mrb[4].mxu0 %vm1068_vm3, %v1556_v10  ;;  %v1585_v10 = vsub.s32 1, %v261_v4 }
  0xa5   :  { %352 = vmatprep.mubr.f32.mxu0 %v152_v55 }
  0xa6   :  { %v267_v12 = vrot.slane %v258_v9, %v1585_v10 }
  0xa8   :  { %353 = vmatmul.mubr.f32.gmra.mrb[6].mxu0 %v140_v20 }
 0x156   :  { %v425_v46 = vpop.f32.mrb[0].mxu1 }
 0x157   :  { %v427_v62 = vpop.f32.mrb[1].mxu1 }
 0x15a   :  { %v431_v63 = vpop.f32.mrb[2].mxu1 }
 0x15b   :  { %v433_v2 = vpop.f32.mrb[3].mxu1 }
 0x15e   :  { %v437_v3 = vpop.f32.mrb[4].mxu1 }
 0x15f   :  { %v439_v5 = vpop.f32.mrb[5].mxu1 }
 0x162   :  { %v443_v6 = vpop.f32.mrb[6].mxu1 }
 0x163   :  { %v445_v8 = vpop.f32.mrb[7].mxu1 }
 0x16f   :  { %v336_v13 = vpop.f32.mrb[0].mxu0 }
 0x170   :  { %v337_v14 = vadd.f32 %v336_v13, %v263_v11  ;;  %v338_v15 = vpop.f32.mrb[1].mxu0 }
 0x171   :  { %v339_v16 = vadd.f32 %v338_v15, %v267_v12 }
 0x172   :  { %v426_v17 = vadd.f32 %v425_v46, %v337_v14 }
 0x173   :  { %v428_v18 = vadd.f32 %v427_v62, %v339_v16  ;;  %v342_v19 = vpop.f32.mrb[2].mxu0 }
 0x174   :  { %v343_v20 = vadd.f32 %v342_v19, %v263_v11  ;;  %v344_v21 = vpop.f32.mrb[3].mxu0 }
 0x175   :  { %v1072_v22 = vmul.f32 -1.442695, %v428_v18  ;;  %v345_v23 = vadd.f32 %v344_v21, %v267_v12 }
 0x176   :  { %v432_v24 = vadd.f32 %v431_v63, %v343_v20 }
 0x177   :  { %1236 = vpow2.f32 %v1072_v22  ;;  %v434_v25 = vadd.f32 %v433_v2, %v345_v23  ;;  %v348_v26 = vpop.f32.mrb[4].mxu0 }
 0x178   :  { %v349_v27 = vadd.f32 %v348_v26, %v263_v11  ;;  %v350_v28 = vpop.f32.mrb[5].mxu0 }
 0x179   :  { %v1073_v29 = vmul.f32 -1.442695, %v434_v25  ;;  %v351_v30 = vadd.f32 %v350_v28, %v267_v12 }
 0x17a   :  { %v438_v31 = vadd.f32 %v437_v3, %v349_v27 }
 0x17b   :  { %1238 = vpow2.f32 %v1073_v29  ;;  %v440_v32 = vadd.f32 %v439_v5, %v351_v30  ;;  %v354_v33 = vpop.f32.mrb[6].mxu0 }
 0x17c   :  { %v355_v34 = vadd.f32 %v354_v33, %v263_v11  ;;  %v356_v35 = vpop.f32.mrb[7].mxu0 }
 0x17d   :  { %v1074_v36 = vmul.f32 -1.442695, %v440_v32  ;;  %v357_v37 = vadd.f32 %v356_v35, %v267_v12 }
 0x17e   :  { %v444_v38 = vadd.f32 %v443_v6, %v355_v34 }
 0x17f   :  { %1240 = vpow2.f32 %v1074_v36  ;;  %v446_v39 = vadd.f32 %v445_v8, %v357_v37 }
 0x181   :  { %v1237_v40 = vpop.eup %1236  ;;  %v1075_v42 = vmul.f32 -1.442695, %v446_v39 }
 0x182   :  { %v460_v43 = vadd.f32 1.0, %v1237_v40 }
 0x183   :  { %1242 = vpow2.f32 %v1075_v42 }
 0x184   :  { %1244 = vrcp.f32 %v460_v43  ;;  %v780_v43 = vld [vmem:[#allocation7 + $0x8] sm:$0xff] }
 0x185   :  { %v1239_v44 = vpop.eup %1238 }
 0x186   :  { %v461_v45 = vadd.f32 1.0, %v1239_v44  ;;  %v782_v44 = vld [vmem:[#allocation7 + $0x18] sm:$0xff] }
 0x188   :  { %1246 = vrcp.f32 %v461_v45  ;;  %v779_v45 = vld [vmem:[#allocation7] sm:$0xff] }
 0x189   :  { %v1241_v47 = vpop.eup %1240 }
 0x18a   :  { %v462_v48 = vadd.f32 1.0, %v1241_v47  ;;  %v1193_v47 = vpack.c.bf16 %v782_v44, %v780_v43 }
 0x18c   :  { %1248 = vrcp.f32 %v462_v48  ;;  %v781_v48 = vld [vmem:[#allocation7 + $0x10] sm:$0xff]  ;;  %1194 = vmatprep.subr.bf16.mxu1 %v1193_v47 }
 0x18d   :  { %v1243_v49 = vpop.eup %1242 }
 0x18e   :  { %v1245_v50 = vpop.eup %1244  ;;  %v463_v51 = vadd.f32 1.0, %v1243_v49  ;;  %v784_v49 = vld [vmem:[#allocation7 + $0x28] sm:$0xff] }
 0x18f   :  { %v472_v53 = vmul.f32 %v1245_v50, %v426_v17  ;;  %v786_v50 = vld [vmem:[#allocation7 + $0x38] sm:$0xff] }
 0x190   :  { %1250 = vrcp.f32 %v463_v51  ;;  %v1195_v51 = vpack.c.bf16 %v781_v48, %v779_v45 }
 0x191   :  { %v478_v54 = vrot.slane %v472_v53, 7  ;;  %v1197_v53 = vpack.c.bf16 %v786_v50, %v784_v49 }
 0x192   :  { %v1247_v55 = vpop.eup %1246 }
 0x193   :  { %v473_v56 = vmul.f32 %v1247_v55, %v432_v24  ;;  %v484_v52 = vsel %vm109_vm0, 0.0, %v478_v54  ;;  %v785_v55 = vld [vmem:[#allocation7 + $0x30] sm:$0xff] }
 0x194   :  { %v488_v62 = vrot.slane %v484_v52, 1  ;;  %v499_v8 = vrot.slane %v484_v52, 2 }
 0x195   :  { %v479_v57 = vrot.slane %v473_v56, 7  ;;  %v788_v56 = vld [vmem:[#allocation7 + $0x48] sm:$0xff] }
 0x196   :  { %v1249_v58 = vpop.eup %1248 }
 0x197   :  { %v480_v59 = vsel %vm109_vm0, %v478_v54, %v479_v57  ;;  %v485_v60 = vsel %vm109_vm0, %v479_v57, 0.0  ;;  %v474_v41 = vmul.f32 %v1249_v58, %v438_v31  ;;  %v783_v54 = vld [vmem:[#allocation7 + $0x20] sm:$0xff]  ;;  %v790_v57 = vld [vmem:[#allocation7 + $0x58] sm:$0xff] }
 0x198   :  { %v489_v61 = vrot.slane %v480_v59, 1  ;;  %v491_v46 = vrot.slane %v485_v60, 1  ;;  %v500_v4 = vrot.slane %v480_v59, 2  ;;  %v502_v5 = vrot.slane %v485_v60, 2  ;;  %v789_v60 = vld [vmem:[#allocation7 + $0x50] sm:$0xff] }
 0x199   :  { %v518_v63 = vrot.slane %v474_v41, 7  ;;  %v1201_v58 = vpack.c.bf16 %v790_v57, %v788_v56 }
 0x19a   :  { %v1251_v1 = vpop.eup %1250  ;;  %v492_v2 = vsel %vm120_vm1, %v489_v61, %v491_v46  ;;  %v490_v3 = vsel %vm120_vm1, %v488_v62, %v489_v61  ;;  %v503_v12 = vsel %vm128_vm2, %v500_v4, %v502_v5  ;;  %v501_v13 = vsel %vm128_vm2, %v499_v8, %v500_v4  ;;  %v560_v61 = vld [vmem:[%s1689_s4] sm:$0x3]  ;;  %s1412_s4 = smov 32  }
 0x19b   :  { %495 = vrot.lane.b32.xlu1 %v492_v2, %s1408_s28  ;;  %493 = vrot.lane.b32.xlu0 %v490_v3, %s1408_s28  ;;  %v475_v6 = vmul.f32 %v1251_v1, %v444_v38  ;;  %v524_v11 = vsel %vm109_vm0, 0.0, %v518_v63  ;;  %v569_v46 = vrot.slane %v560_v61, %v1585_v10 }
 0x19c   :  { %v539_v16 = vrot.slane %v524_v11, 2  ;;  %v528_v18 = vrot.slane %v524_v11, 1 }
 0x19d   :  { %v519_v9 = vrot.slane %v475_v6, 7 }
 0x19f   :  { %506 = vrot.lane.b32.xlu1 %v503_v12, %s1404_s24  ;;  %504 = vrot.lane.b32.xlu0 %v501_v13, %s1404_s24  ;;  %v520_v14 = vsel %vm109_vm0, %v518_v63, %v519_v9  ;;  %v525_v15 = vsel %vm109_vm0, %v519_v9, 0.0 }
 0x1a0   :  { %v540_v17 = vrot.slane %v520_v14, 2  ;;  %v529_v19 = vrot.slane %v520_v14, 1  ;;  %v542_v22 = vrot.slane %v525_v15, 2  ;;  %v531_v23 = vrot.slane %v525_v15, 1 }
 0x1a2   :  { %v541_v20 = vsel %vm128_vm2, %v539_v16, %v540_v17  ;;  %v530_v21 = vsel %vm120_vm1, %v528_v18, %v529_v19  ;;  %v543_v24 = vsel %vm128_vm2, %v540_v17, %v542_v22  ;;  %v532_v25 = vsel %vm120_vm1, %v529_v19, %v531_v23 }
 0x1a3   :  { %544 = vrot.lane.b32.xlu1 %v541_v20, %s1404_s24  ;;  %533 = vrot.lane.b32.xlu0 %v530_v21, %s1408_s28  ;;  %v565_v22 = vrot.slane %v560_v61, %v1580_v7 }
 0x1a7   :  { %546 = vrot.lane.b32.xlu1 %v543_v24, %s1404_s24  ;;  %535 = vrot.lane.b32.xlu0 %v532_v25, %s1408_s28 }
 0x20d   :  { %v496_v26 = vpop.permute.xlu1 %495  ;;  %v494_v27 = vpop.permute.xlu0 %493 }
 0x20e   :  { %v511_v28 = vsel %vm510_vm4, %v484_v52, %v494_v27  ;;  %v512_v32 = vsel %vm510_vm4, %v480_v59, %v496_v26  ;;  %v1199_v52 = vpack.c.bf16 %v785_v55, %v783_v54  ;;  %v787_v59 = vld [vmem:[#allocation7 + $0x40] sm:$0xff] }
 0x20f   :  { %v1203_v41 = vpack.c.bf16 %v789_v60, %v787_v59 }
 0x211   :  { %v507_v29 = vpop.permute.xlu1 %506  ;;  %v505_v30 = vpop.permute.xlu0 %504 }
 0x212   :  { %v514_v31 = vsel %vm513_vm5, %v511_v28, %v505_v30  ;;  %v515_v35 = vsel %vm513_vm5, %v512_v32, %v507_v29 }
 0x213   :  { %1076 = vmatmul.mubr.msk.f32.vlgmr.msra.gmra.mrb[8].mxu1 %vm572_vm6, %v514_v31 }
 0x214   :  { %655 = vmatprep.mubr.f32.mxu1 %v1411_v0  ;;  %1196 = vmatpush1.bf16.msra.mxu1 %v1195_v51 }
 0x215   :  { %v545_v33 = vpop.permute.xlu1 %544  ;;  %v534_v34 = vpop.permute.xlu0 %533  ;;  %1198 = vmatprep.subr.bf16.mxu1 %v1197_v53 }
 0x216   :  { %v550_v36 = vsel %vm510_vm4, %v524_v11, %v534_v34 }
 0x217   :  { %1077 = vmatmul.mubr.msk.f32.gmra.mrb[10].mxu1 %vm572_vm6, %v515_v35  ;;  %v552_v38 = vsel %vm513_vm5, %v550_v36, %v545_v33 }
 0x218   :  { %661 = vmatprep.mubr.f32.mxu1 %v1411_v0  ;;  %1200 = vmatpush1.bf16.msra.mxu1 %v1199_v52 }
 0x219   :  { %v536_v37 = vpop.permute.xlu0 %535  ;;  %v547_v39 = vpop.permute.xlu1 %546  ;;  %1202 = vmatprep.subr.bf16.mxu1 %v1201_v58 }
 0x21a   :  { %v551_v40 = vsel %vm510_vm4, %v520_v14, %v536_v37 }
 0x21b   :  { %1078 = vmatmul.mubr.msk.f32.gmra.mrb[12].mxu1 %vm572_vm6, %v552_v38  ;;  %v553_v42 = vsel %vm513_vm5, %v551_v40, %v547_v39 }
 0x21c   :  { %667 = vmatprep.mubr.f32.mxu1 %v1411_v0  ;;  %1204 = vmatpush1.bf16.msra.mxu1 %v1203_v41 }
 0x21f   :  { %1079 = vmatmul.mubr.msk.f32.gmra.mrb[14].mxu1 %vm572_vm6, %v553_v42 }
 0x220   :  { %880 = vmatprep.mubr.f32.mxu1 %v1411_v0 }
 0x2e6   :  { %v651_v62 = vpop.f32.mrb[8].mxu1 }
 0x2e7   :  { %v653_v63 = vpop.f32.mrb[9].mxu1  ;;  %v652_v25 = vadd.f32 %v651_v62, %v565_v22 }
 0x2e8   :  { %v654_v1 = vadd.f32 %v653_v63, %v569_v46 }
 0x2ea   :  { %v1080_v2 = vmul.f32 -1.442695, %v654_v1  ;;  %v657_v3 = vpop.f32.mrb[10].mxu1 }
 0x2eb   :  { %v659_v4 = vpop.f32.mrb[11].mxu1  ;;  %v658_v29 = vadd.f32 %v657_v3, %v565_v22 }
 0x2ec   :  { %1252 = vpow2.f32 %v1080_v2  ;;  %v660_v5 = vadd.f32 %v659_v4, %v569_v46 }
 0x2ee   :  { %v1081_v6 = vmul.f32 -1.442695, %v660_v5  ;;  %v663_v8 = vpop.f32.mrb[12].mxu1 }
 0x2ef   :  { %v665_v9 = vpop.f32.mrb[13].mxu1  ;;  %v664_v33 = vadd.f32 %v663_v8, %v565_v22 }
 0x2f0   :  { %1254 = vpow2.f32 %v1081_v6  ;;  %v666_v11 = vadd.f32 %v665_v9, %v569_v46 }
 0x2f2   :  { %v1082_v12 = vmul.f32 -1.442695, %v666_v11  ;;  %v669_v13 = vpop.f32.mrb[14].mxu1 }
 0x2f3   :  { %v671_v14 = vpop.f32.mrb[15].mxu1  ;;  %v670_v45 = vadd.f32 %v669_v13, %v565_v22 }
 0x2f4   :  { %1256 = vpow2.f32 %v1082_v12  ;;  %v672_v15 = vadd.f32 %v671_v14, %v569_v46 }
 0x2f6   :  { %v1253_v16 = vpop.eup %1252  ;;  %v1083_v17 = vmul.f32 -1.442695, %v672_v15 }
 0x2f7   :  { %v686_v18 = vadd.f32 1.0, %v1253_v16 }
 0x2f8   :  { %1258 = vpow2.f32 %v1083_v17 }
 0x2f9   :  { %1260 = vrcp.f32 %v686_v18 }
 0x2fa   :  { %v1255_v19 = vpop.eup %1254 }
 0x2fb   :  { %v687_v20 = vadd.f32 1.0, %v1255_v19 }
 0x2fd   :  { %1262 = vrcp.f32 %v687_v20 }
 0x2fe   :  { %v1257_v21 = vpop.eup %1256 }
 0x2ff   :  { %v688_v23 = vadd.f32 1.0, %v1257_v21 }
 0x301   :  { %1264 = vrcp.f32 %v688_v23  ;;  %v950_v23 = vld [vmem:[#allocation9 + $0x8] sm:$0xff] }
 0x302   :  { %v1259_v24 = vpop.eup %1258 }
 0x303   :  { %v1261_v26 = vpop.eup %1260  ;;  %v689_v27 = vadd.f32 1.0, %v1259_v24  ;;  %v952_v24 = vld [vmem:[#allocation9 + $0x18] sm:$0xff] }
 0x304   :  { %v698_v28 = vmul.f32 %v1261_v26, %v652_v25  ;;  %v1205_v25 = vpack.c.bf16 %v952_v24, %v950_v23  ;;  %v949_v26 = vld [vmem:[#allocation9] sm:$0xff]  ;;  %v955_v24 = vld [vmem:[%s1693_s8] sm:$0x3] }
 0x305   :  { %1266 = vrcp.f32 %v689_v27  ;;  %v951_v27 = vld [vmem:[#allocation9 + $0x10] sm:$0xff] }
 0x306   :  { %v704_v30 = vrot.slane %v698_v28, 7  ;;  %v1207_v28 = vpack.c.bf16 %v951_v27, %v949_v26  ;;  %1206 = vmatprep.subr.bf16.mxu1 %v1205_v25  ;;  %v964_v25 = vrot.slane %v955_v24, %v1585_v10 }
 0x307   :  { %v1263_v31 = vpop.eup %1262 }
 0x308   :  { %v699_v32 = vmul.f32 %v1263_v31, %v658_v29  ;;  %v710_v35 = vsel %vm109_vm0, 0.0, %v704_v30  ;;  %v954_v29 = vld [vmem:[#allocation9 + $0x28] sm:$0xff]  ;;  %v791_v31 = vld [vmem:[%s1691_s6] sm:$0x3] }
 0x309   :  { %v725_v40 = vrot.slane %v710_v35, 2  ;;  %v714_v43 = vrot.slane %v710_v35, 1 }
 0x30a   :  { %v705_v34 = vrot.slane %v699_v32, 7  ;;  %v800_v32 = vrot.slane %v791_v31, %v1585_v10 }
 0x30b   :  { %v1265_v36 = vpop.eup %1264 }
 0x30c   :  { %v706_v37 = vsel %vm109_vm0, %v704_v30, %v705_v34  ;;  %v711_v38 = vsel %vm109_vm0, %v705_v34, 0.0  ;;  %v700_v39 = vmul.f32 %v1265_v36, %v664_v33  ;;  %v953_v30 = vld [vmem:[#allocation9 + $0x20] sm:$0xff] }
 0x30d   :  { %v726_v42 = vrot.slane %v706_v37, 2  ;;  %v715_v44 = vrot.slane %v706_v37, 1  ;;  %v728_v51 = vrot.slane %v711_v38, 2  ;;  %v717_v53 = vrot.slane %v711_v38, 1 }
 0x30e   :  { %v743_v47 = vrot.slane %v700_v39, 7 }
 0x30f   :  { %v1267_v48 = vpop.eup %1266  ;;  %v727_v49 = vsel %vm128_vm2, %v725_v40, %v726_v42  ;;  %v716_v50 = vsel %vm120_vm1, %v714_v43, %v715_v44  ;;  %v729_v57 = vsel %vm128_vm2, %v726_v42, %v728_v51  ;;  %v718_v52 = vsel %vm120_vm1, %v715_v44, %v717_v53 }
 0x310   :  { %730 = vrot.lane.b32.xlu1 %v727_v49, %s1412_s4  ;;  %719 = vrot.lane.b32.xlu0 %v716_v50, %s1404_s24  ;;  %v701_v54 = vmul.f32 %v1267_v48, %v670_v45  ;;  %v749_v56 = vsel %vm109_vm0, 0.0, %v743_v47 }
 0x311   :  { %v764_v60 = vrot.slane %v749_v56, 2  ;;  %v753_v61 = vrot.slane %v749_v56, 1 }
 0x312   :  { %v744_v55 = vrot.slane %v701_v54, 7 }
 0x314   :  { %732 = vrot.lane.b32.xlu1 %v729_v57, %s1412_s4  ;;  %721 = vrot.lane.b32.xlu0 %v718_v52, %s1404_s24  ;;  %v745_v58 = vsel %vm109_vm0, %v743_v47, %v744_v55  ;;  %v750_v59 = vsel %vm109_vm0, %v744_v55, 0.0 }
 0x315   :  { %v765_v41 = vrot.slane %v745_v58, 2  ;;  %v754_v46 = vrot.slane %v745_v58, 1  ;;  %v767_v1 = vrot.slane %v750_v59, 2  ;;  %v756_v2 = vrot.slane %v750_v59, 1 }
 0x317   :  { %v766_v62 = vsel %vm128_vm2, %v764_v60, %v765_v41  ;;  %v755_v63 = vsel %vm120_vm1, %v753_v61, %v754_v46  ;;  %v768_v3 = vsel %vm128_vm2, %v765_v41, %v767_v1  ;;  %v757_v4 = vsel %vm120_vm1, %v754_v46, %v756_v2 }
 0x318   :  { %769 = vrot.lane.b32.xlu1 %v766_v62, %s1412_s4  ;;  %758 = vrot.lane.b32.xlu0 %v755_v63, %s1404_s24 }
 0x31c   :  { %771 = vrot.lane.b32.xlu1 %v768_v3, %s1412_s4  ;;  %760 = vrot.lane.b32.xlu0 %v757_v4, %s1404_s24 }
 0x382   :  { %v731_v5 = vpop.permute.xlu1 %730  ;;  %v720_v6 = vpop.permute.xlu0 %719 }
 0x383   :  { %v736_v8 = vsel %vm513_vm5, %v710_v35, %v720_v6 }
 0x384   :  { %v739_v9 = vsel %vm738_vm7, %v736_v8, %v731_v5 }
 0x385   :  { %1084 = vmatmul.mubr.msk.f32.vlgmr.msra.gmra.mrb[16].mxu1 %vm803_vm8, %v739_v9 }
 0x386   :  { %v733_v11 = vpop.permute.xlu1 %732  ;;  %v722_v12 = vpop.permute.xlu0 %721  ;;  %886 = vmatprep.mubr.f32.mxu1 %v1411_v0  ;;  %1208 = vmatpush1.bf16.msra.mxu1 %v1207_v28 }
 0x387   :  { %v737_v13 = vsel %vm513_vm5, %v706_v37, %v722_v12  ;;  %974 = vmatprep.subr.mxu1 %v954_v29 }
 0x388   :  { %v740_v14 = vsel %vm738_vm7, %v737_v13, %v733_v11 }
 0x389   :  { %1085 = vmatmul.mubr.msk.f32.gmra.mrb[18].mxu1 %vm803_vm8, %v740_v14 }
 0x38a   :  { %v770_v15 = vpop.permute.xlu1 %769  ;;  %v759_v16 = vpop.permute.xlu0 %758  ;;  %892 = vmatprep.mubr.f32.mxu1 %v1411_v0  ;;  %975 = vmatpush1.msra.mxu1 %v953_v30 }
 0x38b   :  { %v775_v17 = vsel %vm513_vm5, %v749_v56, %v759_v16  ;;  %v796_v56 = vrot.slane %v791_v31, %v1580_v7 }
 0x38c   :  { %v777_v18 = vsel %vm738_vm7, %v775_v17, %v770_v15 }
 0x38d   :  { %1086 = vmatmul.mubr.msk.f32.gmra.mrb[20].mxu1 %vm803_vm8, %v777_v18 }
 0x38e   :  { %v772_v19 = vpop.permute.xlu1 %771  ;;  %v761_v20 = vpop.permute.xlu0 %760  ;;  %898 = vmatprep.mubr.f32.mxu1 %v1411_v0 }
 0x38f   :  { %v776_v21 = vsel %vm513_vm5, %v745_v58, %v761_v20 }
 0x390   :  { %v778_v22 = vsel %vm738_vm7, %v776_v21, %v772_v19 }
 0x391   :  { %1087 = vmatmul.mubr.msk.f32.gmra.mrb[22].mxu1 %vm803_vm8, %v778_v22 }
 0x392   :  { %1034 = vmatprep.mubr.f32.mxu1 %v1411_v0 }
 0x458   :  { %v882_v33 = vpop.f32.mrb[16].mxu1 }
 0x459   :  { %v884_v0 = vpop.f32.mrb[17].mxu1  ;;  %v883_v58 = vadd.f32 %v882_v33, %v796_v56 }
 0x45a   :  { %v885_v34 = vadd.f32 %v884_v0, %v800_v32  ;;  %v1043_v0 = vld [vmem:[%s1694_s9] sm:$0x3] }
 0x45c   :  { %v1088_v35 = vmul.f32 -1.442695, %v885_v34  ;;  %v888_v36 = vpop.f32.mrb[18].mxu1 }
 0x45d   :  { %v890_v37 = vpop.f32.mrb[19].mxu1  ;;  %v889_v61 = vadd.f32 %v888_v36, %v796_v56 }
 0x45e   :  { %1268 = vpow2.f32 %v1088_v35  ;;  %v891_v38 = vadd.f32 %v890_v37, %v800_v32 }
 0x460   :  { %v1089_v39 = vmul.f32 -1.442695, %v891_v38  ;;  %v894_v40 = vpop.f32.mrb[20].mxu1 }
 0x461   :  { %v896_v42 = vpop.f32.mrb[21].mxu1  ;;  %v895_v1 = vadd.f32 %v894_v40, %v796_v56 }
 0x462   :  { %1270 = vpow2.f32 %v1089_v39  ;;  %v897_v43 = vadd.f32 %v896_v42, %v800_v32 }
 0x464   :  { %v1090_v44 = vmul.f32 -1.442695, %v897_v43  ;;  %v900_v45 = vpop.f32.mrb[22].mxu1 }
 0x465   :  { %v902_v47 = vpop.f32.mrb[23].mxu1  ;;  %v901_v6 = vadd.f32 %v900_v45, %v796_v56 }
 0x466   :  { %1272 = vpow2.f32 %v1090_v44  ;;  %v903_v48 = vadd.f32 %v902_v47, %v800_v32  ;;  %v960_v32 = vrot.slane %v955_v24, %v1580_v7 }
 0x468   :  { %v1269_v49 = vpop.eup %1268  ;;  %v1091_v50 = vmul.f32 -1.442695, %v903_v48 }
 0x469   :  { %v917_v51 = vadd.f32 1.0, %v1269_v49 }
 0x46a   :  { %1274 = vpow2.f32 %v1091_v50 }
 0x46b   :  { %1276 = vrcp.f32 %v917_v51 }
 0x46c   :  { %v1271_v53 = vpop.eup %1270 }
 0x46d   :  { %v918_v54 = vadd.f32 1.0, %v1271_v53 }
 0x46f   :  { %1278 = vrcp.f32 %v918_v54 }
 0x470   :  { %v1273_v55 = vpop.eup %1272 }
 0x471   :  { %v919_v57 = vadd.f32 1.0, %v1273_v55 }
 0x473   :  { %1280 = vrcp.f32 %v919_v57 }
 0x474   :  { %v1275_v52 = vpop.eup %1274 }
 0x475   :  { %v1277_v59 = vpop.eup %1276  ;;  %v920_v60 = vadd.f32 1.0, %v1275_v52 }
 0x476   :  { %v929_v41 = vmul.f32 %v1277_v59, %v883_v58 }
 0x477   :  { %1282 = vrcp.f32 %v920_v60 }
 0x479   :  { %v1279_v46 = vpop.eup %1278 }
 0x47a   :  { %v930_v62 = vmul.f32 %v1279_v46, %v889_v61 }
 0x47c   :  { %v933_v63 = vadd.f32 %v930_v62, %v929_v41 }
 0x47d   :  { %v1281_v2 = vpop.eup %1280 }
 0x47e   :  { %v934_v3 = vrot.slane %v933_v63, 4  ;;  %v931_v4 = vmul.f32 %v1281_v2, %v895_v1 }
 0x480   :  { %v935_v5 = vadd.f32 %v934_v3, %v933_v63 }
 0x481   :  { %v1283_v8 = vpop.eup %1282 }
 0x482   :  { %v932_v9 = vmul.f32 %v1283_v8, %v901_v6  ;;  %v936_v11 = vrot.slane %v935_v5, 2 }
 0x484   :  { %v940_v12 = vadd.f32 %v932_v9, %v931_v4  ;;  %v937_v14 = vadd.f32 %v936_v11, %v935_v5 }
 0x486   :  { %v941_v13 = vrot.slane %v940_v12, 4  ;;  %v938_v17 = vrot.slane %v937_v14, 1 }
 0x488   :  { %v942_v15 = vadd.f32 %v941_v13, %v940_v12  ;;  %v939_v20 = vadd.f32 %v938_v17, %v937_v14 }
 0x48a   :  { %v943_v16 = vrot.slane %v942_v15, 2 }
 0x48c   :  { %v944_v18 = vadd.f32 %v943_v16, %v942_v15 }
 0x48e   :  { %v945_v19 = vrot.slane %v944_v18, 1 }
 0x490   :  { %v946_v21 = vadd.f32 %v945_v19, %v944_v18 }
 0x492   :  { %v947_v22 = vsel %vm109_vm0, %v939_v20, %v946_v21 }
 0x493   :  { %v948_v23 = vmul.f32 0.0625, %v947_v22 }
 0x495   :  { %1092 = vmatmul.mubr.msk.f32.vlgmr.msra.gmra.mrb[24].mxu1 %vm572_vm6, %v948_v23 }
 0x568   :  { %v1036_v26 = vpop.f32.mrb[24].mxu1 }
 0x569   :  { %v1038_v27 = vpop.f32.mrb[25].mxu1  ;;  %v1037_v33 = vadd.f32 %v1036_v26, %v960_v32 }
 0x56a   :  { %v1039_v28 = vadd.f32 %v1038_v27, %v964_v25 }
 0x56b   :  { %v1041_v34 = vmax.f32 %v1037_v33, 0.0 }
 0x56c   :  { %v1042_v29 = vmax.f32 %v1039_v28, 0.0 }
 0x56d   :  { %v1050_v37 = vrot.slane %v1041_v34, 6 }
 0x56e   :  { %v1044_v30 = vmul.f32 0.5, %v1042_v29  ;;  %v1053_v38 = vrot.slane %v1042_v29, 4 }
 0x570   :  { %v1045_v31 = vmul.f32 1.442695, %v1044_v30 }
 0x572   :  { %1284 = vpow2.f32 %v1045_v31 }
 0x57c   :  { %v1285_v35 = vpop.eup %1284 }
 0x57d   :  { %v1047_v36 = vmul.f32 %v1285_v35, %v1043_v0 }
 0x57f   :  { %v1048_v10 = vadd.f32 %v1047_v36, %v1041_v34 }
 0x581   :  { %v1056_v39 = vsel %vm1055_vm9, %v1048_v10, %v1050_v37 }
 0x582   :  { %v1058_v40 = vsel %vm1057_vm10, %v1056_v39, %v1053_v38 }
 0x583   :  { %v1059_v42 = vsel %vm128_vm2, %v1058_v40, 0.0 }
 0x584   :  { %1060 = vst [vmem:[%s1695_s10] sm:$0xff] %v1059_v42 }
 0x585   :  { %1065 = vsyncpa [#allocation3], 1 }
 0x586   :  { %1066 = vsyncpa [#allocation5], 1 }
 0x587   :  { %1067 = vsyncpa [#allocation8], 1 }

</bundles_post_ra>
